<compile_context>
chip_gen: v7x
topology: tpu7x:2x2x1
jax: 0.10.0
libtpu: 0.0.40
codegen_flags: <defaults>
</compile_context>

<pallas_src>
import jax
import jax.numpy as jnp
from jax.experimental import pallas as pl
from jax.experimental.pallas import tpu as pltpu

EMBED_DIM = 16
NUM_HEADS = 2
HIDDEN = 64
NUM_CLASSES = 3
OUT_SUB = 8            # logits padded to 8 rows (sublane alignment for f32)
LANE = 128
BN_EPS = 1e-5


# ----------------------------------------------------------------------------
# Pallas kernel (transposed layout: batch on lanes).
#   x_ref     : (2, TB)       row 0 = ehr scalar, row 1 = bio scalar
#   w_enc_ref : (2E, 3)       col 0 = ehr enc weights, col 1 = bio enc weights, col 2 = bias
#   w_h_ref   : (64, 2E)      folded hidden weights (transposed)
#   w_out_ref : (8, 64)       fusion2 weights, rows >= 3 are zero
#   b_ref     : (64, 2)       col 0 = hidden bias, col 1[:8] = output bias
#   out_ref   : (8, TB)       rows >= 3 are zero padding
# ----------------------------------------------------------------------------
def _mmt_kernel(x_ref, w_enc_ref, w_h_ref, w_out_ref, b_ref, out_ref):
    ehr = x_ref[0:1, :]                                   # (1, TB)
    bio = x_ref[1:2, :]                                   # (1, TB)

    # Packed encoders: pure VPU broadcasts (sublane-broadcast row x lane-dense column).
    feat = jnp.maximum(
        w_enc_ref[:, 0:1] * ehr + w_enc_ref[:, 1:2] * bio + w_enc_ref[:, 2:3],
        0.0,
    )                                                     # (2E, TB)

    # Folded (attention paths + ab_proj + fusion1 + BatchNorm) hidden layer.
    h = jnp.maximum(
        jnp.dot(w_h_ref[...], feat, preferred_element_type=jnp.float32)
        + b_ref[:, 0:1],
        0.0,
    )                                                     # (64, TB)

    # TODO(synk): Dropout(0.1) is stochastic in train mode; eval-mode identity used here.
    out_ref[...] = (
        jnp.dot(w_out_ref[...], h, preferred_element_type=jnp.float32)
        + b_ref[0:OUT_SUB, 1:2]
    )                                                     # (8, TB)


# ----------------------------------------------------------------------------
# Host-side parameter folding (exact up to f32 reassociation).
# ----------------------------------------------------------------------------
def fold_params(p, embed_dim=EMBED_DIM):
    E = embed_dim
    f32 = lambda a: jnp.asarray(a, jnp.float32)

    # Shared MHA value path: attn(value=v) == v @ M + m0   (softmax over one key == 1)
    Wv_m = f32(p["mha_in_w"][2 * E:3 * E])          # (E, E) torch (out, in)
    bv_m = f32(p["mha_in_b"][2 * E:3 * E])
    Wo, bo = (f32(a) for a in p["mha_out"])
    M = Wv_m.T @ Wo.T                               # (E, E) (in, out)
    m0 = bv_m @ Wo.T + bo                           # (E,)

    # bio_ehr_attn = ehr_feat @ P1 + c1 ; ehr_bio_attn = bio_feat @ P2 + c2
    W_ehr_v, b_ehr_v = (f32(a) for a in p["ehr_v"])
    W_bio_v, b_bio_v = (f32(a) for a in p["bio_v"])
    P1 = W_ehr_v.T @ M
    c1 = b_ehr_v @ M + m0
    P2 = W_bio_v.T @ M
    c2 = b_bio_v @ M + m0

    # ab = cat([bio_ehr, ehr_bio]) @ W_ab^T + b_ab  ->  ehr_feat@G1 + bio_feat@G2 + g0
    W_ab, b_ab = (f32(a) for a in p["ab_proj"])     # (E, 2E), (E,)
    A = W_ab.T                                      # (2E, E)
    A_top, A_bot = A[:E], A[E:]
    G1 = P1 @ A_top
    G2 = P2 @ A_bot
    g0 = c1 @ A_top + c2 @ A_bot + b_ab

    # z = cat([ab, img_ab_attn]) @ W_f1^T + b_f1 with img_ab_attn = ab@M + m0
    #   = ab @ (F_top + M@F_bot) + (m0@F_bot + b_f1) ; then fold BatchNorm (inference).
    W_f1, b_f1 = (f32(a) for a in p["fusion1"])     # (64, 2E), (64,)
    F = W_f1.T                                      # (2E, 64)
    F_top, F_bot = F[:E], F[E:]
    Fc = F_top + M @ F_bot
    f0 = m0 @ F_bot + b_f1
    scale = f32(p["bn_gamma"]) * jax.lax.rsqrt(f32(p["bn_var"]) + BN_EPS)
    Fc = Fc * scale
    f0 = (f0 - f32(p["bn_mean"])) * scale + f32(p["bn_beta"])

    # h_pre = ehr_feat @ H1 + bio_feat @ H2 + h0
    H1 = G1 @ Fc                                    # (E, 64)
    H2 = G2 @ Fc
    h0 = g0 @ Fc + f0                               # (64,)

    # Encoder slab (2E, 3): feat_T = relu(col0*ehr_row + col1*bio_row + col2)
    W_ehr_e, b_ehr_e = (f32(a) for a in p["ehr_enc"])   # (E,1), (E,)
    W_bio_e, b_bio_e = (f32(a) for a in p["bio_enc"])
    w_enc = jnp.zeros((2 * E, 3), jnp.float32)
    w_enc = w_enc.at[:E, 0].set(W_ehr_e[:, 0])
    w_enc = w_enc.at[E:, 1].set(W_bio_e[:, 0])
    w_enc = w_enc.at[:E, 2].set(b_ehr_e).at[E:, 2].set(b_bio_e)

    # Hidden slab (transposed): h_T = relu(w_h_t @ feat_T + h0[:, None])
    w_h_t = jnp.concatenate([H1, H2], axis=0).T          # (64, 2E)

    # Output head (transposed, sublane-padded 3 -> 8).
    W_f2, b_f2 = (f32(a) for a in p["fusion2"])          # (3, 64), (3,)
    w_out_t = jnp.zeros((OUT_SUB, HIDDEN), jnp.float32).at[:NUM_CLASSES, :].set(W_f2)

    # Bias slab (64, 2): col 0 = hidden bias, col 1[:3] = output bias.
    b_slab = jnp.zeros((HIDDEN, 2), jnp.float32)
    b_slab = b_slab.at[:, 0].set(h0).at[:NUM_CLASSES, 1].set(b_f2)

    return {"w_enc": w_enc, "w_h_t": w_h_t, "w_out_t": w_out_t, "b_slab": b_slab}


# ----------------------------------------------------------------------------
# Wrapper: transposed batch grid, parallel semantics, lane-dense in/out tiles.
# ----------------------------------------------------------------------------
def multimodal_transformer(x, folded, *, block_b=4096):
    x = jnp.asarray(x, jnp.float32)
    B = x.shape[0]

    # Only the live modality columns (imaging column is provably dead), batch on lanes.
    x_t = jnp.stack([x[:, 0], x[:, 2]], axis=0)          # (2, B)

    b128 = max(LANE, ((B + LANE - 1) // LANE) * LANE)    # lane-aligned padded batch
    tb = min(((block_b + LANE - 1) // LANE) * LANE, b128)
    n_blocks = -(-b128 // tb)
    # v7x has 2 TensorCores: prefer an even number of grid steps when possible.
    if n_blocks % 2 == 1 and b128 >= 2 * LANE:
        n_blocks += 1
        tb = ((-(-b128 // n_blocks) + LANE - 1) // LANE) * LANE
    B_pad = n_blocks * tb
    if B_pad != B:
        x_t = jnp.pad(x_t, ((0, 0), (0, B_pad - B)))

    w_enc, w_h_t, w_out_t, b_slab = (folded["w_enc"], folded["w_h_t"],
                                     folded["w_out_t"], folded["b_slab"])

    def resident(shape):  # full-array block, same block every step (copied once)
        return pl.BlockSpec(shape, lambda i: (0, 0))

    out_t = pl.pallas_call(
        _mmt_kernel,
        out_shape=jax.ShapeDtypeStruct((OUT_SUB, B_pad), jnp.float32),
        grid=(n_blocks,),
        in_specs=[
            pl.BlockSpec((2, tb), lambda i: (0, i)),
            resident(w_enc.shape),
            resident(w_h_t.shape),
            resident(w_out_t.shape),
            resident(b_slab.shape),
        ],
        out_specs=pl.BlockSpec((OUT_SUB, tb), lambda i: (0, i)),
        compiler_params=pltpu.CompilerParams(dimension_semantics=("parallel",)),
    )(x_t, w_enc, w_h_t, w_out_t, b_slab)

    # Contiguous 3-row slice of the transposed logits, returned batch-first.
    return out_t[:NUM_CLASSES, :B].T


# ----------------------------------------------------------------------------
# Deterministic parameter construction (torch layouts) + pure-JAX reference.
# ----------------------------------------------------------------------------
def _linear_params(key, in_f, out_f):
    kw, kb = jax.random.split(key)
    bound = 1.0 / (in_f ** 0.5)
    w = jax.random.uniform(kw, (out_f, in_f), jnp.float32, -bound, bound)
    b = jax.random.uniform(kb, (out_f,), jnp.float32, -bound, bound)
    return w, b


def init_params(key, embed_dim=EMBED_DIM):
    keys = jax.random.split(key, 16)
    p = {}
    p["ehr_enc"] = _linear_params(keys[0], 1, embed_dim)
    p["img_enc"] = _linear_params(keys[1], 1, embed_dim)
    p["bio_enc"] = _linear_params(keys[2], 1, embed_dim)
    p["bio_q"] = _linear_params(keys[3], embed_dim, embed_dim)
    p["bio_k"] = _linear_params(keys[4], embed_dim, embed_dim)
    p["bio_v"] = _linear_params(keys[5], embed_dim, embed_dim)
    p["ehr_q"] = _linear_params(keys[6], embed_dim, embed_dim)
    p["ehr_k"] = _linear_params(keys[7], embed_dim, embed_dim)
    p["ehr_v"] = _linear_params(keys[8], embed_dim, embed_dim)
    p["img_q"] = _linear_params(keys[9], embed_dim, embed_dim)
    p["img_k"] = _linear_params(keys[10], embed_dim, embed_dim)
    p["img_v"] = _linear_params(keys[11], embed_dim, embed_dim)
    kin, kinb, kout = jax.random.split(keys[12], 3)
    bound = 1.0 / (embed_dim ** 0.5)
    p["mha_in_w"] = jax.random.uniform(kin, (3 * embed_dim, embed_dim), jnp.float32, -bound, bound)
    p["mha_in_b"] = jax.random.uniform(kinb, (3 * embed_dim,), jnp.float32, -bound, bound)
    p["mha_out"] = _linear_params(kout, embed_dim, embed_dim)
    p["ab_proj"] = _linear_params(keys[13], 2 * embed_dim, embed_dim)
    p["fusion1"] = _linear_params(keys[14], 2 * embed_dim, HIDDEN)
    p["bn_gamma"] = jnp.ones((HIDDEN,), jnp.float32)
    p["bn_beta"] = jnp.zeros((HIDDEN,), jnp.float32)
    p["bn_mean"] = jnp.zeros((HIDDEN,), jnp.float32)
    p["bn_var"] = jnp.ones((HIDDEN,), jnp.float32)
    p["fusion2"] = _linear_params(keys[15], HIDDEN, NUM_CLASSES)
    return p


def _mha_ref(query, key, value, p, num_heads=NUM_HEADS):
    E = query.shape[-1]
    hd = E // num_heads
    Wq, Wk, Wv = p["mha_in_w"][:E], p["mha_in_w"][E:2 * E], p["mha_in_w"][2 * E:]
    bq, bk, bv = p["mha_in_b"][:E], p["mha_in_b"][E:2 * E], p["mha_in_b"][2 * E:]
    Wo, bo = p["mha_out"]
    q = query @ Wq.T + bq
    k = key @ Wk.T + bk
    v = value @ Wv.T + bv
    B = q.shape[0]
    qh = q.reshape(B, num_heads, hd)
    kh = k.reshape(B, num_heads, hd)
    vh = v.reshape(B, num_heads, hd)
    scores = jnp.sum(qh * kh, axis=-1, keepdims=True) / jnp.sqrt(float(hd))
    w = jax.nn.softmax(scores, axis=-1)          # single key position -> exactly 1
    attn = (w * vh).reshape(B, E)
    return attn @ Wo.T + bo


def reference_forward(x, p):
    x = jnp.asarray(x, jnp.float32)
    ehr, img, bio = x[:, 0:1], x[:, 1:2], x[:, 2:3]

    def enc(v, name):
        W, b = p[name]
        return jax.nn.relu(v @ W.T + b)

    def lin(v, name):
        W, b = p[name]
        return v @ W.T + b

    ehr_feat, img_feat, bio_feat = enc(ehr, "ehr_enc"), enc(img, "img_enc"), enc(bio, "bio_enc")
    Qa, Ka, Va = lin(bio_feat, "bio_q"), lin(bio_feat, "bio_k"), lin(bio_feat, "bio_v")
    Qb, Kb, Vb = lin(ehr_feat, "ehr_q"), lin(ehr_feat, "ehr_k"), lin(ehr_feat, "ehr_v")
    Qc = lin(img_feat, "img_q")
    bio_ehr = _mha_ref(Qa, Kb, Vb, p)
    ehr_bio = _mha_ref(Qb, Ka, Va, p)
    ab = jnp.concatenate([bio_ehr, ehr_bio], axis=1)
    W_ab, b_ab = p["ab_proj"]
    ab = ab @ W_ab.T + b_ab
    img_ab = _mha_ref(Qc, ab, ab, p)
    final = jnp.concatenate([ab, img_ab], axis=1)
    W1, b1 = p["fusion1"]
    z = final @ W1.T + b1
    scale = p["bn_gamma"] / jnp.sqrt(p["bn_var"] + BN_EPS)
    z = (z - p["bn_mean"]) * scale + p["bn_beta"]
    z = jax.nn.relu(z)
    W2, b2 = p["fusion2"]
    return z @ W2.T + b2


if __name__ == "__main__":
    key = jax.random.PRNGKey(0)
    k_param, k_x = jax.random.split(key)
    params = init_params(k_param)
    folded = fold_params(params)

    # Small batch, not a multiple of 128 -> exercises padding and a 2-step (even) grid.
    B = 300
    x = jax.random.normal(k_x, (B, 3), dtype=jnp.float32)

    run = jax.jit(lambda xx: multimodal_transformer(xx, folded))
    out = jax.block_until_ready(run(x))

    assert out.shape == (B, NUM_CLASSES), out.shape
    assert bool(jnp.all(jnp.isfinite(out)))

    ref = reference_forward(x, params)
    err = float(jnp.max(jnp.abs(out - ref)))
    assert jnp.allclose(out, ref, atol=1e-3, rtol=1e-3), err
    print("KERNEL_OK")
</pallas_src>

<mosaic_0001>
module attributes {stable_mosaic.version = 11 : i64} {
  func.func @_mmt_kernel(%arg0: i32, %arg1: memref<2x256xf32, #tpu.memory_space<vmem>>, %arg2: memref<32x3xf32, #tpu.memory_space<vmem>>, %arg3: memref<64x32xf32, #tpu.memory_space<vmem>>, %arg4: memref<8x64xf32, #tpu.memory_space<vmem>>, %arg5: memref<64x2xf32, #tpu.memory_space<vmem>>, %arg6: memref<8x256xf32, #tpu.memory_space<vmem>>) attributes {dimension_semantics = [#tpu.dimension_semantics<parallel>], iteration_bounds = array<i64: 2>, scalar_prefetch = 0 : i64, scratch_operands = 0 : i64, tpu.core_type = #tpu.core_type<tc>, window_params = [{transform_indices = @transform_0, window_bounds = array<i64: 2, 256>}, {pipeline_mode = #tpu.pipeline_mode<synchronous>, transform_indices = @transform_1, window_bounds = array<i64: 32, 3>}, {pipeline_mode = #tpu.pipeline_mode<synchronous>, transform_indices = @transform_2, window_bounds = array<i64: 64, 32>}, {pipeline_mode = #tpu.pipeline_mode<synchronous>, transform_indices = @transform_3, window_bounds = array<i64: 8, 64>}, {pipeline_mode = #tpu.pipeline_mode<synchronous>, transform_indices = @transform_4, window_bounds = array<i64: 64, 2>}, {transform_indices = @transform_5, window_bounds = array<i64: 8, 256>}]} {
    %c0 = arith.constant 0 : index
    %c0_0 = arith.constant 0 : index
    %0 = vector.load %arg1[%c0, %c0_0] : memref<2x256xf32, #tpu.memory_space<vmem>>, vector<1x256xf32>
    %c1 = arith.constant 1 : index
    %c0_1 = arith.constant 0 : index
    %1 = vector.load %arg1[%c1, %c0_1] : memref<2x256xf32, #tpu.memory_space<vmem>>, vector<1x256xf32>
    %c0_2 = arith.constant 0 : index
    %c0_3 = arith.constant 0 : index
    %2 = vector.load %arg2[%c0_2, %c0_3] : memref<32x3xf32, #tpu.memory_space<vmem>>, vector<32x1xf32>
    %3 = vector.broadcast %2 : vector<32x1xf32> to vector<32x256xf32>
    %4 = vector.broadcast %0 : vector<1x256xf32> to vector<32x256xf32>
    %5 = arith.mulf %3, %4 : vector<32x256xf32>
    %c0_4 = arith.constant 0 : index
    %c1_5 = arith.constant 1 : index
    %6 = vector.load %arg2[%c0_4, %c1_5] : memref<32x3xf32, #tpu.memory_space<vmem>>, vector<32x1xf32>
    %7 = vector.broadcast %6 : vector<32x1xf32> to vector<32x256xf32>
    %8 = vector.broadcast %1 : vector<1x256xf32> to vector<32x256xf32>
    %9 = arith.mulf %7, %8 : vector<32x256xf32>
    %10 = arith.addf %5, %9 : vector<32x256xf32>
    %c0_6 = arith.constant 0 : index
    %c2 = arith.constant 2 : index
    %11 = vector.load %arg2[%c0_6, %c2] : memref<32x3xf32, #tpu.memory_space<vmem>>, vector<32x1xf32>
    %12 = vector.broadcast %11 : vector<32x1xf32> to vector<32x256xf32>
    %13 = arith.addf %10, %12 : vector<32x256xf32>
    %cst = arith.constant 0.000000e+00 : f32
    %14 = vector.broadcast %cst : f32 to vector<32x256xf32>
    %15 = arith.maximumf %13, %14 : vector<32x256xf32>
    %c0_7 = arith.constant 0 : index
    %c0_8 = arith.constant 0 : index
    %16 = vector.load %arg3[%c0_7, %c0_8] : memref<64x32xf32, #tpu.memory_space<vmem>>, vector<64x32xf32>
    %cst_9 = arith.constant dense<0.000000e+00> : vector<64x256xf32>
    %17 = tpu.matmul %16, %15, %cst_9 {dimension_numbers = #tpu.dot_dimension_numbers<[1], [0], [0], [1], [0, 0, 1, 1], [], []>} : vector<64x32xf32>, vector<32x256xf32>, vector<64x256xf32> -> vector<64x256xf32>
    %c0_10 = arith.constant 0 : index
    %c0_11 = arith.constant 0 : index
    %18 = vector.load %arg5[%c0_10, %c0_11] : memref<64x2xf32, #tpu.memory_space<vmem>>, vector<64x1xf32>
    %19 = vector.broadcast %18 : vector<64x1xf32> to vector<64x256xf32>
    %20 = arith.addf %17, %19 : vector<64x256xf32>
    %cst_12 = arith.constant 0.000000e+00 : f32
    %21 = vector.broadcast %cst_12 : f32 to vector<64x256xf32>
    %22 = arith.maximumf %20, %21 : vector<64x256xf32>
    %c0_13 = arith.constant 0 : index
    %c0_14 = arith.constant 0 : index
    %23 = vector.load %arg4[%c0_13, %c0_14] : memref<8x64xf32, #tpu.memory_space<vmem>>, vector<8x64xf32>
    %cst_15 = arith.constant dense<0.000000e+00> : vector<8x256xf32>
    %24 = tpu.matmul %23, %22, %cst_15 {dimension_numbers = #tpu.dot_dimension_numbers<[1], [0], [0], [1], [0, 0, 1, 1], [], []>} : vector<8x64xf32>, vector<64x256xf32>, vector<8x256xf32> -> vector<8x256xf32>
    %c0_16 = arith.constant 0 : index
    %c1_17 = arith.constant 1 : index
    %25 = vector.load %arg5[%c0_16, %c1_17] : memref<64x2xf32, #tpu.memory_space<vmem>>, vector<8x1xf32>
    %26 = vector.broadcast %25 : vector<8x1xf32> to vector<8x256xf32>
    %27 = arith.addf %24, %26 : vector<8x256xf32>
    %c0_18 = arith.constant 0 : index
    %c0_19 = arith.constant 0 : index
    %28 = vector.load %arg6[%c0_18, %c0_19] : memref<8x256xf32, #tpu.memory_space<vmem>>, vector<8x256xf32>
    tpu.vector_store %arg6[%c0_18, %c0_19], %27 {strides = array<i32>} : memref<8x256xf32, #tpu.memory_space<vmem>>, vector<8x256xf32>,
    return
  }
  func.func @transform_0(%arg0: i32) -> (i32, i32) {
    %c0_i32 = arith.constant 0 : i32
    %c0_i32_0 = arith.constant 0 : i32
    return %c0_i32, %arg0 : i32, i32
  }
  func.func @transform_1(%arg0: i32) -> (i32, i32) {
    %c0_i32 = arith.constant 0 : i32
    %c0_i32_0 = arith.constant 0 : i32
    %c0_i32_1 = arith.constant 0 : i32
    return %c0_i32, %c0_i32_0 : i32, i32
  }
  func.func @transform_2(%arg0: i32) -> (i32, i32) {
    %c0_i32 = arith.constant 0 : i32
    %c0_i32_0 = arith.constant 0 : i32
    %c0_i32_1 = arith.constant 0 : i32
    return %c0_i32, %c0_i32_0 : i32, i32
  }
  func.func @transform_3(%arg0: i32) -> (i32, i32) {
    %c0_i32 = arith.constant 0 : i32
    %c0_i32_0 = arith.constant 0 : i32
    %c0_i32_1 = arith.constant 0 : i32
    return %c0_i32, %c0_i32_0 : i32, i32
  }
  func.func @transform_4(%arg0: i32) -> (i32, i32) {
    %c0_i32 = arith.constant 0 : i32
    %c0_i32_0 = arith.constant 0 : i32
    %c0_i32_1 = arith.constant 0 : i32
    return %c0_i32, %c0_i32_0 : i32, i32
  }
  func.func @transform_5(%arg0: i32) -> (i32, i32) {
    %c0_i32 = arith.constant 0 : i32
    %c0_i32_0 = arith.constant 0 : i32
    return %c0_i32, %arg0 : i32, i32
  }
}

</mosaic_0001>

<bundles_post_ra>
// kernel: _lambda_.1
= control target key start
LH: loop header
LB: loop body
LE: loop exit
PB: predicated region body
PF: predicated region fallthrough
CT: control target
= control target key end

     0   :  { %10 = vsyncpa [#allocation3], 0  ;;  %s1088_s0 = inlined_call_operand.vmem [shape: f32[2,512], index: 0, kind: input, shape index: {}]   ;;  %s1089_s1 = inlined_call_operand.vmem [shape: f32[32,3], index: 1, kind: input, shape index: {}]   ;;  %s1090_s2 = inlined_call_operand.hbm [shape: f32[64,32], index: 2, kind: input, shape index: {}]   ;;  %s1091_s3 = inlined_call_operand.vmem [shape: f32[8,64], index: 3, kind: input, shape index: {}]   ;;  %s1092_s4 = inlined_call_operand.hbm [shape: f32[64,2], index: 4, kind: input, shape index: {}]   ;;  %s1093_s5 = inlined_call_operand.vmem [shape: f32[8,512], index: 5, kind: output, shape index: {}]  }
   0x1   :  { %11 = vsyncpa [#allocation5], 0  ;;  %s956_s18 = smov 0  }
   0x2 LB: > { %s751_s19 = sadd.s32 4294967295, %s916_s18   ;;  %p753_p0 = scmp.ge.s32.totalorder %s916_s18, 1  ;;  %s916_s18 = sphi %s956_s18, %s17_s18  }
   0x3   : > { %p158_p1 = scmp.lt.s32.totalorder %s916_s18, 3  ;;  %s918_s20 = smov [#allocation2]  }
   0x4   : > { %s173_s21 = sshll.u32 %s918_s20, 4  ;;  %p970_p3 = scmp.eq.s32.totalorder %s751_s19, 0  ;;  %s174_s21 = int_to_ptr.vmem [resolvable:$true] %s173_s21 }
   0x5   : > { %p964_p2 = pnand %p753_p0, %p158_p1  ;;  %s919_s24 = smov [#allocation4]  }
   0x6   : > { %s1098_s23 = scalar_select %p970_p3, 1, 0 }
   0x7   : > { %s1097_s22 = scalar_select %p964_p2, 1, 0 }
   0x8   : > { %p808_p4 = pneg %p964_p2  ;;  %s189_s25 = sshll.u32 %s919_s24, 4  ;;  %s982_s25 = int_to_ptr.vmem [resolvable:$true] %s189_s25 }
   0x9   : > { %s846_s29 = scalar_lea.hbm %s1090_s2, 1024 }
   0xa   : > { %p978_p5 = pnand %p970_p3, %p808_p4  ;;  %p847_p6 = scmp.ne.s32.totalorder %s1090_s2, %s846_s29 }
   0xb   : > { %p853_p10 = scmp.lt.u32.totalorder %s846_s29, %s1090_s2 }
   0xc   : > { %p848_p7 = pneg %p978_p5 }
   0xe   : > { %p849_p8 = pnand %p848_p7, %p847_p6 }
  0x10   : > { %p850_p9 = pneg %p849_p8 }
  0x12   : > { %p855_p11 = pnand %p853_p10, %p850_p9 }
  0x14   : > { %858 = shalt.err (!%p855_p11)
}
  0x15   : > { %s859_s9 = scalar_lea.vmem %s174_s21, 1024  ;;  %p867_p1 = scmp.lt.s32.totalorder %s174_s21, %s174_s21 }
  0x16   : > { %p860_p12 = scmp.ne.s32.totalorder %s174_s21, %s859_s9  ;;  %p868_p4 = scmp.lt.s32.totalorder %s859_s9, %s859_s9 }
  0x18   : > { %p862_p13 = pnand %p860_p12, %p848_p7  ;;  %p869_p3 = por %p868_p4, %p867_p1 }
  0x1a   : > { %p863_p0 = pneg %p862_p13 }
  0x1c   : > { %p870_p2 = pnand %p869_p3, %p863_p0 }
  0x1e   : > { %873 = shalt.err (!%p870_p2)
}
  0x1f   : > { %s920_s10 = smov 128   ;;  %s921_s11 = smov 8  }
  0x20   : > { %811 = dma.hbm_to_vmem [thread:$0]  (!%p978_p5), %s1090_s2, 1024, %s174_s21, [#allocation3], %s920_s10, %s920_s10, %s921_s11  }
  0x21   : > { %s874_s16 = scalar_lea.hbm %s1092_s4, 1024 }
  0x22   : > { %p875_p6 = scmp.ne.s32.totalorder %s1092_s4, %s874_s16  ;;  %p881_p8 = scmp.lt.u32.totalorder %s874_s16, %s1092_s4 }
  0x24   : > { %p877_p2 = pnand %p875_p6, %p848_p7 }
  0x26   : > { %p878_p3 = pneg %p877_p2 }
  0x28   : > { %p883_p9 = pnand %p881_p8, %p878_p3 }
  0x2a   : > { %886 = shalt.err (!%p883_p9)
}
  0x2b   : > { %s887_s21 = scalar_lea.vmem %s982_s25, 1024  ;;  %p895_p13 = scmp.lt.s32.totalorder %s982_s25, %s982_s25 }
  0x2c   : > { %p888_p10 = scmp.ne.s32.totalorder %s982_s25, %s887_s21  ;;  %p896_p0 = scmp.lt.s32.totalorder %s887_s21, %s887_s21 }
  0x2e   : > { %p890_p11 = pnand %p888_p10, %p848_p7  ;;  %p897_p1 = por %p896_p0, %p895_p13 }
  0x30   : > { %p891_p12 = pneg %p890_p11 }
  0x32   : > { %p898_p4 = pnand %p897_p1, %p891_p12 }
  0x34   : > { %901 = shalt.err (!%p898_p4)
}
  0x35   : > { %814 = dma.hbm_to_vmem [thread:$0]  (!%p978_p5), %s1092_s4, 1024, %s982_s25, [#allocation5], %s920_s10, %s920_s10, %s921_s11  }
  0x36   : > { %p1100_p6 = scmp.ne.s32.totalorder %s1097_s22, 0 }
  0x37   : > { %p1101_p2 = scmp.ne.s32.totalorder (!%p1100_p6), %s1098_s23, 0 }
  0x38   : > { %214 = sbr.rel (%p1100_p6) target bundleno = 700 (0x2bc), region = 40 }
  0x3f   : > { %907 = dma.done.wait (%p1101_p2), [#allocation3], 1024  }
  0x40   : > { %909 = vsyncadd (%p1101_p2), [#allocation3], 4294966272 }
  0x41   : > { %911 = dma.done.wait (%p1101_p2), [#allocation5], 1024  }
  0x42   : > { %913 = vsyncadd (%p1101_p2), [#allocation5], 4294966272  ;;  %v922_v0 = vmov 1   ;;  %v923_v1 = vmov 0   ;;  %v261_v2 = vld [vmem:[%s1089_s1] sm:$0xff]  ;;  %v262_v3 = vld [vmem:[%s1089_s1 + $0x8] sm:$0xff]  ;;  %v286_v16 = vlaneseq }
  0x43   : > { %836 = vset.pattern.permute.xlu1 %v922_v0  ;;  %835 = vset.pattern.permute.xlu0 %v923_v1  ;;  %v263_v4 = vld [vmem:[%s1089_s1 + $0x10] sm:$0xff]  ;;  %v264_v5 = vld [vmem:[%s1089_s1 + $0x18] sm:$0xff]  ;;  %v924_v6 = vmov 2   ;;  %v925_v7 = vmov 0.0   ;;  %v387_v8 = vld [vmem:[#allocation4] sm:$0xff]  ;;  %s760_s9 = sshll.u32 %s751_s19, 1 }
  0x44   : > { %305 = vperm.xlu1 %836, %v261_v2   ;;  %267 = vperm.xlu0 %835, %v261_v2   ;;  %v388_v9 = vld [vmem:[#allocation4 + $0x8] sm:$0xff]  ;;  %v389_v10 = vld [vmem:[#allocation4 + $0x10] sm:$0xff]  ;;  %v390_v11 = vld [vmem:[#allocation4 + $0x18] sm:$0xff]  ;;  %p247_p5 = scmp.lt.s32.totalorder %s760_s9, 3  ;;  %v287_v19 = vshrl.u32 %v286_v16, 7  ;;  %vm435_vm0 = vcmask 261120  }
  0x45   : > { %524 = vmatprep.mubr.f32.mxu0 %v925_v7  ;;  %664 = vmatprep.mubr.f32.mxu1 %v925_v7  ;;  %v391_v12 = vld [vmem:[#allocation4 + $0x20] sm:$0xff]  ;;  %v392_v13 = vld [vmem:[#allocation4 + $0x28] sm:$0xff]  ;;  %v393_v14 = vld [vmem:[#allocation4 + $0x30] sm:$0xff]  ;;  %vm596_vm1 = vcmask 523264  }
  0x46   : > { %v394_v15 = vld [vmem:[#allocation4 + $0x38] sm:$0xff]  ;;  %s1103_s9 = smov (!%p247_p5, %s760_s9), 3  ;;  %v288_v22 = vsub.s32 0, %v287_v19  ;;  %v292_v23 = vsub.s32 1, %v287_v19  ;;  %v379_v19 = vld [vmem:[#allocation2] sm:$0xff] }
  0x47   : > { %s761_s10 = sshll.u32 %s1103_s9, 1  ;;  %s763_s15 = sshll.u32 %s1103_s9, 3 }
  0x48   : > { %309 = vperm.xlu1 %836, %v262_v3   ;;  %272 = vperm.xlu0 %835, %v262_v3   ;;  %s250_s13 = scalar_lea.vmem %s1088_s0, %s761_s10  ;;  %s256_s20 = scalar_lea.vmem %s1093_s5, %s763_s15 }
  0x49   : > { %v764_v24 = vld [vmem:[%s250_s13 + $0x1] ss:$2 sm:$0x3]  ;;  %v258_v25 = vld [vmem:[%s250_s13] ss:$2 sm:$0x3] }
  0x4a   : > { %v324_v28 = vrot.slane %v764_v24, %v288_v22  ;;  %v328_v29 = vrot.slane %v764_v24, %v292_v23  ;;  %v289_v30 = vrot.slane %v258_v25, %v288_v22  ;;  %v293_v31 = vrot.slane %v258_v25, %v292_v23  ;;  %v382_v22 = vld [vmem:[#allocation2 + $0x18] sm:$0xff]  ;;  %v383_v23 = vld [vmem:[#allocation2 + $0x20] sm:$0xff]  ;;  %v384_v24 = vld [vmem:[#allocation2 + $0x28] sm:$0xff] }
  0x4b   : > { %v385_v25 = vld [vmem:[#allocation2 + $0x30] sm:$0xff] }
  0x4c   : > { %837 = vset.pattern.permute.xlu1 %v923_v1  ;;  %277 = vperm.xlu0 %835, %v263_v4  }
  0x4d   : > { %282 = vperm.xlu1 %837, %v264_v5  }
  0x50   : > { %838 = vset.pattern.permute.xlu0 %v922_v0 }
  0x51   : > { %839 = vset.pattern.permute.xlu1 %v922_v0  ;;  %313 = vperm.xlu0 %838, %v263_v4  }
  0x52   : > { %317 = vperm.xlu1 %839, %v264_v5  }
  0x55   : > { %841 = vset.pattern.permute.xlu0 %v924_v6 }
  0x56   : > { %840 = vset.pattern.permute.xlu1 %v924_v6  ;;  %352 = vperm.xlu0 %841, %v262_v3  }
  0x57   : > { %348 = vperm.xlu1 %840, %v261_v2  }
  0x5a   : > { %842 = vset.pattern.permute.xlu0 %v923_v1 }
  0x5b   : > { %356 = vperm.xlu1 %840, %v263_v4   ;;  %397 = vperm.xlu0 %842, %v387_v8  }
  0x5f   : > { %360 = vperm.xlu1 %840, %v264_v5   ;;  %412 = vperm.xlu0 %842, %v390_v11  }
  0x63   : > { %843 = vset.pattern.permute.xlu1 %v923_v1  ;;  %422 = vperm.xlu0 %842, %v392_v13  }
  0x64   : > { %402 = vperm.xlu1 %843, %v388_v9  }
  0x67   : > { %432 = vperm.xlu0 %842, %v394_v15  }
  0x68   : > { %407 = vperm.xlu1 %843, %v389_v10  }
  0x6b   : > { %845 = vset.pattern.permute.xlu0 %v922_v0 }
  0x6c   : > { %417 = vperm.xlu1 %843, %v391_v12  }
  0x70   : > { %427 = vperm.xlu1 %843, %v393_v14  }
  0x74   : > { %844 = vset.pattern.permute.xlu1 %v922_v0 }
  0x75   : > { %593 = vperm.xlu1 %844, %v387_v8  }
  0xc3   : > { %v306_v17 = vpop.permute.xlu1 %305  ;;  %v268_v18 = vpop.permute.xlu0 %267 }
  0xc4   : > { %v331_v37 = vmul.f32 %v324_v28, %v306_v17  ;;  %v332_v38 = vmul.f32 %v328_v29, %v306_v17  ;;  %v296_v39 = vmul.f32 %v289_v30, %v268_v18  ;;  %v297_v40 = vmul.f32 %v293_v31, %v268_v18 }
  0xc6   : > { %v339_v45 = vadd.f32 %v331_v37, %v296_v39  ;;  %v340_v46 = vadd.f32 %v332_v38, %v297_v40 }
  0xc7   : > { %v310_v20 = vpop.permute.xlu1 %309  ;;  %v273_v21 = vpop.permute.xlu0 %272 }
  0xc8   : > { %v333_v32 = vmul.f32 %v324_v28, %v310_v20  ;;  %v334_v33 = vmul.f32 %v328_v29, %v310_v20  ;;  %v298_v34 = vmul.f32 %v289_v30, %v273_v21  ;;  %v299_v35 = vmul.f32 %v293_v31, %v273_v21  ;;  %v380_v20 = vld [vmem:[#allocation2 + $0x8] sm:$0xff]  ;;  %v381_v21 = vld [vmem:[#allocation2 + $0x10] sm:$0xff] }
  0xca   : > { %v341_v42 = vadd.f32 %v333_v32, %v298_v34  ;;  %v342_v43 = vadd.f32 %v334_v33, %v299_v35 }
  0xcb   : > { %v278_v26 = vpop.permute.xlu0 %277 }
  0xcc   : > { %v283_v27 = vpop.permute.xlu1 %282  ;;  %v300_v54 = vmul.f32 %v289_v30, %v278_v26  ;;  %v301_v55 = vmul.f32 %v293_v31, %v278_v26  ;;  %v386_v26 = vld [vmem:[#allocation2 + $0x38] sm:$0xff] }
  0xcd   : > { %v302_v62 = vmul.f32 %v289_v30, %v283_v27  ;;  %v303_v63 = vmul.f32 %v293_v31, %v283_v27 }
  0xd0   : > { %v314_v36 = vpop.permute.xlu0 %313 }
  0xd1   : > { %v318_v41 = vpop.permute.xlu1 %317  ;;  %v335_v50 = vmul.f32 %v324_v28, %v314_v36  ;;  %v336_v51 = vmul.f32 %v328_v29, %v314_v36 }
  0xd2   : > { %v337_v58 = vmul.f32 %v324_v28, %v318_v41  ;;  %v338_v59 = vmul.f32 %v328_v29, %v318_v41 }
  0xd3   : > { %v343_v1 = vadd.f32 %v335_v50, %v300_v54  ;;  %v344_v2 = vadd.f32 %v336_v51, %v301_v55 }
  0xd4   : > { %v345_v8 = vadd.f32 %v337_v58, %v302_v62  ;;  %v346_v9 = vadd.f32 %v338_v59, %v303_v63 }
  0xd5   : > { %v353_v44 = vpop.permute.xlu0 %352 }
  0xd6   : > { %v365_v47 = vadd.f32 %v353_v44, %v341_v42  ;;  %v366_v48 = vadd.f32 %v353_v44, %v342_v43  ;;  %v349_v49 = vpop.permute.xlu1 %348 }
  0xd7   : > { %v363_v52 = vadd.f32 %v349_v49, %v339_v45  ;;  %v364_v53 = vadd.f32 %v349_v49, %v340_v46 }
  0xd8   : > { %v373_v56 = vmax.f32 %v365_v47, 0.0  ;;  %v374_v57 = vmax.f32 %v366_v48, 0.0 }
  0xd9   : > { %v371_v60 = vmax.f32 %v363_v52, 0.0  ;;  %v372_v61 = vmax.f32 %v364_v53, 0.0 }
  0xda   : > { %v357_v0 = vpop.permute.xlu1 %356  ;;  %v398_v27 = vpop.permute.xlu0 %397 }
  0xdb   : > { %v776_v3 = vpack.c.bf16 %v374_v57, %v372_v61  ;;  %v778_v4 = vpack.c.bf16 %v373_v56, %v371_v60  ;;  %v367_v5 = vadd.f32 %v357_v0, %v343_v1  ;;  %v368_v6 = vadd.f32 %v357_v0, %v344_v2 }
  0xdd   : > { %777 = vmatprep.subr.bf16.mxu0 %v776_v3  ;;  %v375_v13 = vmax.f32 %v367_v5, 0.0  ;;  %v376_v14 = vmax.f32 %v368_v6, 0.0 }
  0xde   : > { %v361_v10 = vpop.permute.xlu1 %360  ;;  %779 = vmatpush1.bf16.msra.mxu0 %v778_v4  ;;  %v413_v46 = vpop.permute.xlu0 %412 }
  0xdf   : > { %v369_v11 = vadd.f32 %v361_v10, %v345_v8  ;;  %v370_v12 = vadd.f32 %v361_v10, %v346_v9 }
  0xe1   : > { %v377_v15 = vmax.f32 %v369_v11, 0.0  ;;  %v378_v16 = vmax.f32 %v370_v12, 0.0 }
  0xe2   : > { %v423_v62 = vpop.permute.xlu0 %422 }
  0xe3   : > { %v780_v17 = vpack.c.bf16 %v378_v16, %v376_v14  ;;  %v782_v18 = vpack.c.bf16 %v377_v15, %v375_v13  ;;  %v403_v30 = vpop.permute.xlu1 %402 }
  0xe5   : > { %781 = vmatprep.subr.bf16.mxu0 %v780_v17 }
  0xe6   : > { %783 = vmatpush1.bf16.msra.mxu0 %v782_v18  ;;  %v433_v15 = vpop.permute.xlu0 %432 }
  0xe7   : > { %v408_v41 = vpop.permute.xlu1 %407 }
  0xe9   : > { %765 = vmatmul.mubr.msk.f32.vlgmr.msra.gmra.mrb[0].mxu0 %vm435_vm0, %v379_v19 }
  0xea   : > { %530 = vmatprep.mubr.f32.mxu0 %v925_v7 }
  0xeb   : > { %v418_v59 = vpop.permute.xlu1 %417 }
  0xed   : > { %766 = vmatmul.mubr.msk.f32.gmra.mrb[2].mxu0 %vm435_vm0, %v380_v20 }
  0xee   : > { %536 = vmatprep.mubr.f32.mxu0 %v925_v7 }
  0xef   : > { %v428_v12 = vpop.permute.xlu1 %427 }
  0xf1   : > { %767 = vmatmul.mubr.msk.f32.gmra.mrb[4].mxu0 %vm435_vm0, %v381_v21 }
  0xf2   : > { %542 = vmatprep.mubr.f32.mxu0 %v925_v7 }
  0xf5   : > { %768 = vmatmul.mubr.msk.f32.gmra.mrb[6].mxu0 %vm435_vm0, %v382_v22 }
  0xf6   : > { %548 = vmatprep.mubr.f32.mxu0 %v925_v7 }
  0xf9   : > { %769 = vmatmul.mubr.msk.f32.gmra.mrb[8].mxu0 %vm435_vm0, %v383_v23 }
  0xfa   : > { %554 = vmatprep.mubr.f32.mxu0 %v925_v7 }
  0xfd   : > { %770 = vmatmul.mubr.msk.f32.gmra.mrb[10].mxu0 %vm435_vm0, %v384_v24 }
  0xfe   : > { %560 = vmatprep.mubr.f32.mxu0 %v925_v7 }
 0x101   : > { %771 = vmatmul.mubr.msk.f32.gmra.mrb[12].mxu0 %vm435_vm0, %v385_v25 }
 0x102   : > { %566 = vmatprep.mubr.f32.mxu0 %v925_v7 }
 0x105   : > { %772 = vmatmul.mubr.msk.f32.gmra.mrb[14].mxu0 %vm435_vm0, %v386_v26 }
 0x1bc   : > { %v526_v28 = vpop.f32.mrb[0].mxu0 }
 0x1bd   : > { %v528_v29 = vpop.f32.mrb[1].mxu0  ;;  %v527_v31 = vadd.f32 %v526_v28, %v398_v27  ;;  %v594_v28 = vpop.permute.xlu1 %593 }
 0x1be   : > { %v529_v32 = vadd.f32 %v528_v29, %v398_v27  ;;  %v589_v27 = vld [vmem:[%s1091_s3] sm:$0xff] }
 0x1bf   : > { %v573_v37 = vmax.f32 %v527_v31, 0.0 }
 0x1c0   : > { %v532_v33 = vpop.f32.mrb[2].mxu0  ;;  %v574_v39 = vmax.f32 %v529_v32, 0.0 }
 0x1c1   : > { %v533_v34 = vadd.f32 %v532_v33, %v403_v30  ;;  %v534_v35 = vpop.f32.mrb[3].mxu0 }
 0x1c2   : > { %v535_v36 = vadd.f32 %v534_v35, %v403_v30 }
 0x1c3   : > { %v575_v38 = vmax.f32 %v533_v34, 0.0 }
 0x1c4   : > { %v576_v40 = vmax.f32 %v535_v36, 0.0  ;;  %v538_v42 = vpop.f32.mrb[4].mxu0 }
 0x1c5   : > { %v540_v7 = vpop.f32.mrb[5].mxu0  ;;  %v786_v43 = vpack.c.bf16 %v575_v38, %v573_v37  ;;  %v539_v45 = vadd.f32 %v538_v42, %v408_v41 }
 0x1c6   : > { %v784_v44 = vpack.c.bf16 %v576_v40, %v574_v39  ;;  %v541_v47 = vadd.f32 %v540_v7, %v408_v41 }
 0x1c7   : > { %v577_v52 = vmax.f32 %v539_v45, 0.0 }
 0x1c8   : > { %v544_v48 = vpop.f32.mrb[6].mxu0  ;;  %785 = vmatprep.subr.bf16.mxu1 %v784_v44  ;;  %v578_v54 = vmax.f32 %v541_v47, 0.0 }
 0x1c9   : > { %v545_v49 = vadd.f32 %v544_v48, %v413_v46  ;;  %v546_v50 = vpop.f32.mrb[7].mxu0  ;;  %787 = vmatpush1.bf16.msra.mxu1 %v786_v43 }
 0x1ca   : > { %v547_v51 = vadd.f32 %v546_v50, %v413_v46 }
 0x1cb   : > { %v579_v53 = vmax.f32 %v545_v49, 0.0 }
 0x1cc   : > { %v580_v55 = vmax.f32 %v547_v51, 0.0  ;;  %v550_v56 = vpop.f32.mrb[8].mxu0 }
 0x1cd   : > { %v790_v57 = vpack.c.bf16 %v579_v53, %v577_v52  ;;  %v552_v58 = vpop.f32.mrb[9].mxu0  ;;  %v551_v61 = vadd.f32 %v550_v56, %v418_v59 }
 0x1ce   : > { %v788_v60 = vpack.c.bf16 %v580_v55, %v578_v54  ;;  %v553_v63 = vadd.f32 %v552_v58, %v418_v59 }
 0x1cf   : > { %v581_v4 = vmax.f32 %v551_v61, 0.0 }
 0x1d0   : > { %v556_v0 = vpop.f32.mrb[10].mxu0  ;;  %789 = vmatprep.subr.bf16.mxu1 %v788_v60  ;;  %v582_v6 = vmax.f32 %v553_v63, 0.0 }
 0x1d1   : > { %v557_v1 = vadd.f32 %v556_v0, %v423_v62  ;;  %v558_v2 = vpop.f32.mrb[11].mxu0  ;;  %791 = vmatpush1.bf16.msra.mxu1 %v790_v57 }
 0x1d2   : > { %v559_v3 = vadd.f32 %v558_v2, %v423_v62 }
 0x1d3   : > { %v583_v5 = vmax.f32 %v557_v1, 0.0 }
 0x1d4   : > { %v584_v8 = vmax.f32 %v559_v3, 0.0  ;;  %v562_v9 = vpop.f32.mrb[12].mxu0 }
 0x1d5   : > { %v794_v10 = vpack.c.bf16 %v583_v5, %v581_v4  ;;  %v564_v11 = vpop.f32.mrb[13].mxu0  ;;  %v563_v14 = vadd.f32 %v562_v9, %v428_v12 }
 0x1d6   : > { %v792_v13 = vpack.c.bf16 %v584_v8, %v582_v6  ;;  %v565_v16 = vadd.f32 %v564_v11, %v428_v12 }
 0x1d7   : > { %v585_v21 = vmax.f32 %v563_v14, 0.0 }
 0x1d8   : > { %v568_v17 = vpop.f32.mrb[14].mxu0  ;;  %793 = vmatprep.subr.bf16.mxu1 %v792_v13  ;;  %v586_v23 = vmax.f32 %v565_v16, 0.0 }
 0x1d9   : > { %v569_v18 = vadd.f32 %v568_v17, %v433_v15  ;;  %v570_v19 = vpop.f32.mrb[15].mxu0  ;;  %795 = vmatpush1.bf16.msra.mxu1 %v794_v10 }
 0x1da   : > { %v571_v20 = vadd.f32 %v570_v19, %v433_v15 }
 0x1db   : > { %v587_v22 = vmax.f32 %v569_v18, 0.0 }
 0x1dc   : > { %v588_v24 = vmax.f32 %v571_v20, 0.0 }
 0x1dd   : > { %v798_v25 = vpack.c.bf16 %v587_v22, %v585_v21 }
 0x1de   : > { %v796_v26 = vpack.c.bf16 %v588_v24, %v586_v23 }
 0x1e0   : > { %797 = vmatprep.subr.bf16.mxu1 %v796_v26 }
 0x1e1   : > { %799 = vmatpush1.bf16.msra.mxu1 %v798_v25 }
 0x1e4   : > { %773 = vmatmul.mubr.msk.f32.vlgmr.msra.gmra.mrb[0].mxu1 %vm596_vm1, %v589_v27 }
 0x2b7   : > { %v666_v29 = vpop.f32.mrb[0].mxu1 }
 0x2b8   : > { %v667_v30 = vadd.f32 %v666_v29, %v594_v28  ;;  %v668_v31 = vpop.f32.mrb[1].mxu1 }
 0x2b9   : > { %v669_v32 = vadd.f32 %v668_v31, %v594_v28 }
 0x2ba   : > { %671 = vst [vmem:[%s256_s20] sm:$0xff] %v667_v30 }
 0x2bb   : > { %672 = vst [vmem:[%s256_s20 + $0x8] sm:$0xff] %v669_v32 }
 0x2bc PF: > { %s17_s18 = sadd.s32 1, %s916_s18  }
 0x2bd   : > { %p14_p7 = scmp.ge.s32.totalorder %s17_s18, 4  }
 0x2bf   :  { %16 = sbr.rel (!%p14_p7) target bundleno = 2 (0x2), region = 80 }
 0x2c6   :  { %695 = vsyncpa [#allocation3], 1 }
 0x2c7   :  { %697 = vsyncpa [#allocation3 + $0x1], 1 }
 0x2c8   :  { %698 = vsyncpa [#allocation5], 1 }

</bundles_post_ra>
